<compile_context>
chip_gen: v5e
topology: v5e:2x2
jax: 0.10.0
libtpu: 0.0.40
codegen_flags: <defaults>
</compile_context>

<pallas_src>
import jax
import jax.numpy as jnp
from jax.experimental import pallas as pl
from jax.experimental.pallas import tpu as pltpu


def _mlp_kernel(x_ref, w1_ref, b1_ref, w2_ref, b2_ref, w3_ref, b3_ref, o_ref):
    # x_ref: (TB, lib_sz) tile of the batch; weights fully resident.
    x = x_ref[...]

    # fc1 + relu   (MXU matmul, f32 accumulation) — dominates FLOPs & bytes.
    h1 = jnp.dot(x, w1_ref[...], preferred_element_type=jnp.float32) + b1_ref[...]
    h1 = jnp.maximum(h1, 0.0)

    # fc2 + relu   (tiny epilogue)
    h2 = jnp.dot(h1, w2_ref[...], preferred_element_type=jnp.float32) + b2_ref[...]
    h2 = jnp.maximum(h2, 0.0)

    # fc + sigmoid
    logits = jnp.dot(h2, w3_ref[...], preferred_element_type=jnp.float32) + b3_ref[...]
    o_ref[...] = jax.nn.sigmoid(logits)


def _round_up(n, m):
    return ((n + m - 1) // m) * m


def model_forward(x, params, length=None):
    """Pallas forward pass.  `length` is accepted (to mirror the PyTorch
    signature) but unused, exactly like the reference module."""
    del length  # unused by the reference forward pass
    w1, b1, w2, b2, w3, b3 = params
    B, lib_sz = x.shape

    # Batch tile: up to 1024 rows per grid step, multiple of 8 (sublane).
    TB = min(1024, _round_up(max(B, 1), 8))
    B_pad = _round_up(B, TB)
    if B_pad != B:
        x = jnp.pad(x, ((0, B_pad - B), (0, 0)))
    grid = (pl.cdiv(B_pad, TB),)

    # x tile streams over the batch; weights/biases stay resident (block (0,0)
    # every step).  All weight blocks equal their full array shapes.
    x_spec = pl.BlockSpec((TB, lib_sz), lambda i: (i, 0))
    w1_spec = pl.BlockSpec(w1.shape, lambda i: (0, 0))
    b1_spec = pl.BlockSpec(b1.shape, lambda i: (0, 0))
    w2_spec = pl.BlockSpec(w2.shape, lambda i: (0, 0))
    b2_spec = pl.BlockSpec(b2.shape, lambda i: (0, 0))
    w3_spec = pl.BlockSpec(w3.shape, lambda i: (0, 0))
    b3_spec = pl.BlockSpec(b3.shape, lambda i: (0, 0))
    out_spec = pl.BlockSpec((TB, 1), lambda i: (i, 0))

    # VMEM budget: double-buffered x tiles + (conservatively double-buffered)
    # weights + output tiles + headroom.  Capped well below v7x's 64 MiB.
    weight_bytes = sum(int(p.size) * p.dtype.itemsize for p in params)
    x_tile_bytes = TB * lib_sz * x.dtype.itemsize
    out_tile_bytes = TB * 4
    vmem_needed = 2 * x_tile_bytes + 2 * weight_bytes + 2 * out_tile_bytes + (1 << 20)
    vmem_limit = int(min(max(vmem_needed, 32 * 1024 * 1024), 60 * 1024 * 1024))
    # TODO(synk): for very large lib_sz (w1 no longer fits VMEM, esp. v7x's
    # 64 MiB), add a K-tiling grid axis over lib_sz with an f32 accumulator
    # scratch and move the fc2/fc/sigmoid epilogue under pl.when(k == last).

    cost = pl.CostEstimate(
        flops=2 * B_pad * (lib_sz * 128 + 128 * 16 + 16 * 1),
        transcendentals=B_pad,  # sigmoid
        bytes_accessed=x_tile_bytes * grid[0] + weight_bytes + 4 * B_pad,
    )

    out = pl.pallas_call(
        _mlp_kernel,
        out_shape=jax.ShapeDtypeStruct((B_pad, 1), jnp.float32),
        grid=grid,
        in_specs=[x_spec, w1_spec, b1_spec, w2_spec, b2_spec, w3_spec, b3_spec],
        out_specs=out_spec,
        compiler_params=pltpu.CompilerParams(
            dimension_semantics=("parallel",),  # shard batch across TCs on v7x
            vmem_limit_bytes=vmem_limit,
        ),
        cost_estimate=cost,
    )(x, w1, b1, w2, b2, w3, b3)

    return out[:B]


def init_params(key, lib_sz):
    """Deterministic init mirroring the Linear layer shapes of the module.
    Weights are stored as (in_features, out_features); biases as (1, out)."""
    k1, k2, k3, k4, k5, k6 = jax.random.split(key, 6)

    def uniform(k, shape, fan_in):
        bound = 1.0 / jnp.sqrt(fan_in)
        return jax.random.uniform(k, shape, jnp.float32, -bound, bound)

    w1 = uniform(k1, (lib_sz, 128), lib_sz)
    b1 = uniform(k2, (1, 128), lib_sz)
    w2 = uniform(k3, (128, 16), 128)
    b2 = uniform(k4, (1, 16), 128)
    w3 = uniform(k5, (16, 1), 16)
    b3 = uniform(k6, (1, 1), 16)
    return (w1, b1, w2, b2, w3, b3)


if __name__ == "__main__":
    key = jax.random.PRNGKey(0)
    kx, kp = jax.random.split(key)

    B = 8          # batch
    LIB_SZ = 256   # input feature size (lib_sz)

    x = jax.random.normal(kx, (B, LIB_SZ), dtype=jnp.float32)
    length = jnp.full((B,), LIB_SZ, dtype=jnp.int32)  # unused, mirrors signature
    params = init_params(kp, LIB_SZ)

    out = model_forward(x, params, length)
    out = jax.block_until_ready(out)

    # sanity: reference computation in plain JAX
    w1, b1, w2, b2, w3, b3 = params
    ref = jax.nn.sigmoid(
        jnp.maximum(jnp.maximum(x @ w1 + b1, 0.0) @ w2 + b2, 0.0) @ w3 + b3
    )
    assert out.shape == (B, 1)
    assert jnp.allclose(out, ref, atol=1e-5, rtol=1e-5)

    print("KERNEL_OK")
</pallas_src>

<mosaic_0001>
module attributes {stable_mosaic.version = 11 : i64} {
  func.func @_mlp_kernel(%arg0: i32, %arg1: memref<8x256xf32, #tpu.memory_space<vmem>>, %arg2: memref<256x128xf32, #tpu.memory_space<vmem>>, %arg3: memref<1x128xf32, #tpu.memory_space<vmem>>, %arg4: memref<128x16xf32, #tpu.memory_space<vmem>>, %arg5: memref<1x16xf32, #tpu.memory_space<vmem>>, %arg6: memref<16x1xf32, #tpu.memory_space<vmem>>, %arg7: memref<1x1xf32, #tpu.memory_space<vmem>>, %arg8: memref<8x1xf32, #tpu.memory_space<vmem>>) attributes {dimension_semantics = [#tpu.dimension_semantics<parallel>], iteration_bounds = array<i64: 1>, scalar_prefetch = 0 : i64, scratch_operands = 0 : i64, tpu.core_type = #tpu.core_type<tc>, window_params = [{transform_indices = @transform_0, window_bounds = array<i64: 8, 256>}, {pipeline_mode = #tpu.pipeline_mode<synchronous>, transform_indices = @transform_1, window_bounds = array<i64: 256, 128>}, {pipeline_mode = #tpu.pipeline_mode<synchronous>, transform_indices = @transform_2, window_bounds = array<i64: 1, 128>}, {pipeline_mode = #tpu.pipeline_mode<synchronous>, transform_indices = @transform_3, window_bounds = array<i64: 128, 16>}, {pipeline_mode = #tpu.pipeline_mode<synchronous>, transform_indices = @transform_4, window_bounds = array<i64: 1, 16>}, {pipeline_mode = #tpu.pipeline_mode<synchronous>, transform_indices = @transform_5, window_bounds = array<i64: 16, 1>}, {pipeline_mode = #tpu.pipeline_mode<synchronous>, transform_indices = @transform_6, window_bounds = array<i64: 1, 1>}, {transform_indices = @transform_7, window_bounds = array<i64: 8, 1>}]} {
    %c0 = arith.constant 0 : index
    %c0_0 = arith.constant 0 : index
    %0 = vector.load %arg1[%c0, %c0_0] : memref<8x256xf32, #tpu.memory_space<vmem>>, vector<8x256xf32>
    %c0_1 = arith.constant 0 : index
    %c0_2 = arith.constant 0 : index
    %1 = vector.load %arg2[%c0_1, %c0_2] : memref<256x128xf32, #tpu.memory_space<vmem>>, vector<256x128xf32>
    %cst = arith.constant dense<0.000000e+00> : vector<8x128xf32>
    %2 = tpu.matmul %0, %1, %cst {dimension_numbers = #tpu.dot_dimension_numbers<[1], [0], [0], [1], [0, 0, 1, 1], [], []>} : vector<8x256xf32>, vector<256x128xf32>, vector<8x128xf32> -> vector<8x128xf32>
    %c0_3 = arith.constant 0 : index
    %c0_4 = arith.constant 0 : index
    %3 = vector.load %arg3[%c0_3, %c0_4] : memref<1x128xf32, #tpu.memory_space<vmem>>, vector<1x128xf32>
    %4 = vector.broadcast %3 : vector<1x128xf32> to vector<8x128xf32>
    %5 = arith.addf %2, %4 : vector<8x128xf32>
    %cst_5 = arith.constant 0.000000e+00 : f32
    %6 = vector.broadcast %cst_5 : f32 to vector<8x128xf32>
    %7 = arith.maximumf %5, %6 : vector<8x128xf32>
    %c0_6 = arith.constant 0 : index
    %c0_7 = arith.constant 0 : index
    %8 = vector.load %arg4[%c0_6, %c0_7] : memref<128x16xf32, #tpu.memory_space<vmem>>, vector<128x16xf32>
    %cst_8 = arith.constant dense<0.000000e+00> : vector<8x16xf32>
    %9 = tpu.matmul %7, %8, %cst_8 {dimension_numbers = #tpu.dot_dimension_numbers<[1], [0], [0], [1], [0, 0, 1, 1], [], []>} : vector<8x128xf32>, vector<128x16xf32>, vector<8x16xf32> -> vector<8x16xf32>
    %c0_9 = arith.constant 0 : index
    %c0_10 = arith.constant 0 : index
    %10 = vector.load %arg5[%c0_9, %c0_10] : memref<1x16xf32, #tpu.memory_space<vmem>>, vector<1x16xf32>
    %11 = vector.broadcast %10 : vector<1x16xf32> to vector<8x16xf32>
    %12 = arith.addf %9, %11 : vector<8x16xf32>
    %cst_11 = arith.constant 0.000000e+00 : f32
    %13 = vector.broadcast %cst_11 : f32 to vector<8x16xf32>
    %14 = arith.maximumf %12, %13 : vector<8x16xf32>
    %c0_12 = arith.constant 0 : index
    %c0_13 = arith.constant 0 : index
    %15 = vector.load %arg6[%c0_12, %c0_13] : memref<16x1xf32, #tpu.memory_space<vmem>>, vector<16x1xf32>
    %cst_14 = arith.constant dense<0.000000e+00> : vector<8x1xf32>
    %16 = tpu.matmul %14, %15, %cst_14 {dimension_numbers = #tpu.dot_dimension_numbers<[1], [0], [0], [1], [0, 0, 1, 1], [], []>} : vector<8x16xf32>, vector<16x1xf32>, vector<8x1xf32> -> vector<8x1xf32>
    %c0_15 = arith.constant 0 : index
    %c0_16 = arith.constant 0 : index
    %17 = vector.load %arg7[%c0_15, %c0_16] : memref<1x1xf32, #tpu.memory_space<vmem>>, vector<1x1xf32>
    %18 = vector.broadcast %17 : vector<1x1xf32> to vector<8x1xf32>
    %19 = arith.addf %16, %18 : vector<8x1xf32>
    %20 = arith.negf %19 : vector<8x1xf32>
    %21 = math.exp %20 : vector<8x1xf32>
    %cst_17 = arith.constant 1.000000e+00 : f32
    %22 = vector.broadcast %cst_17 : f32 to vector<8x1xf32>
    %23 = arith.addf %22, %21 : vector<8x1xf32>
    %24 = arith.divf %22, %23 : vector<8x1xf32>
    %c0_18 = arith.constant 0 : index
    %c0_19 = arith.constant 0 : index
    %25 = vector.load %arg8[%c0_18, %c0_19] : memref<8x1xf32, #tpu.memory_space<vmem>>, vector<8x1xf32>
    tpu.vector_store %arg8[%c0_18, %c0_19], %24 {strides = array<i32>} : memref<8x1xf32, #tpu.memory_space<vmem>>, vector<8x1xf32>,
    return
  }
  func.func @transform_0(%arg0: i32) -> (i32, i32) {
    %c0_i32 = arith.constant 0 : i32
    %c0_i32_0 = arith.constant 0 : i32
    return %arg0, %c0_i32 : i32, i32
  }
  func.func @transform_1(%arg0: i32) -> (i32, i32) {
    %c0_i32 = arith.constant 0 : i32
    %c0_i32_0 = arith.constant 0 : i32
    %c0_i32_1 = arith.constant 0 : i32
    return %c0_i32, %c0_i32_0 : i32, i32
  }
  func.func @transform_2(%arg0: i32) -> (i32, i32) {
    %c0_i32 = arith.constant 0 : i32
    %c0_i32_0 = arith.constant 0 : i32
    %c0_i32_1 = arith.constant 0 : i32
    return %c0_i32, %c0_i32_0 : i32, i32
  }
  func.func @transform_3(%arg0: i32) -> (i32, i32) {
    %c0_i32 = arith.constant 0 : i32
    %c0_i32_0 = arith.constant 0 : i32
    %c0_i32_1 = arith.constant 0 : i32
    return %c0_i32, %c0_i32_0 : i32, i32
  }
  func.func @transform_4(%arg0: i32) -> (i32, i32) {
    %c0_i32 = arith.constant 0 : i32
    %c0_i32_0 = arith.constant 0 : i32
    %c0_i32_1 = arith.constant 0 : i32
    return %c0_i32, %c0_i32_0 : i32, i32
  }
  func.func @transform_5(%arg0: i32) -> (i32, i32) {
    %c0_i32 = arith.constant 0 : i32
    %c0_i32_0 = arith.constant 0 : i32
    %c0_i32_1 = arith.constant 0 : i32
    return %c0_i32, %c0_i32_0 : i32, i32
  }
  func.func @transform_6(%arg0: i32) -> (i32, i32) {
    %c0_i32 = arith.constant 0 : i32
    %c0_i32_0 = arith.constant 0 : i32
    %c0_i32_1 = arith.constant 0 : i32
    return %c0_i32, %c0_i32_0 : i32, i32
  }
  func.func @transform_7(%arg0: i32) -> (i32, i32) {
    %c0_i32 = arith.constant 0 : i32
    %c0_i32_0 = arith.constant 0 : i32
    return %arg0, %c0_i32 : i32, i32
  }
}

</mosaic_0001>

<bundles_post_ra>
// kernel: tpu_custom_call.1
= control target key start
LH: loop header
LB: loop body
LE: loop exit
PB: predicated region body
PF: predicated region fallthrough
CT: control target
= control target key end

     0   :  { %s376_s0 = inlined_call_operand.vmem [shape: f32[8,256], index: 0, kind: input, shape index: {}]   ;;  %s377_s1 = inlined_call_operand.hbm [shape: f32[256,128], index: 1, kind: input, shape index: {}]   ;;  %s378_s2 = inlined_call_operand.vmem [shape: f32[1,128], index: 2, kind: input, shape index: {}]   ;;  %s379_s3 = inlined_call_operand.vmem [shape: f32[128,16], index: 3, kind: input, shape index: {}]   ;;  %s380_s4 = inlined_call_operand.vmem [shape: f32[1,16], index: 4, kind: input, shape index: {}]   ;;  %s381_s5 = inlined_call_operand.vmem [shape: f32[16,1], index: 5, kind: input, shape index: {}]   ;;  %s382_s6 = inlined_call_operand.<no memory space> [shape: f32[1,1], index: 6, kind: input, shape index: {}]   ;;  %s383_s7 = inlined_call_operand.vmem [shape: f32[8,1], index: 7, kind: output, shape index: {}]  }
   0x1   :  { %v12_v0 = vstv %s382_s6 }
   0x2   :  { %13 = vst [vmem:[#allocation2] sm:$0x1] %v12_v0 }
   0x3   :  { %14 = vsyncpa [#allocation4], 0  ;;  %s21_s28 = sshll.u32 %s377_s1, 4  ;;  %s258_s29 = smov [#allocation3]   ;;  %s22_s28 = int_to_ptr.hbm [resolvable:$true] %s21_s28 }
   0x4   :  { %s23_s30 = sshll.u32 %s258_s29, 4  ;;  %s259_s8 = smov 128   ;;  %s24_s30 = int_to_ptr.vmem [resolvable:$true] %s23_s30 }
   0x5   :  { %s260_s9 = smov 8  }
   0x6   :  { %29 = dma.hbm_to_vmem [thread:$0]  %s22_s28, 4096, %s24_s30, [#allocation4], %s259_s8, %s259_s8, %s260_s9  }
   0x7   :  { %256 = dma.done.wait [#allocation4], 4096  }
   0x8   :  { %257 = vsyncadd [#allocation4], 4294963200  ;;  %v61_v1 = vld [vmem:[#allocation3 + $0x78] sm:$0xff]  ;;  %v60_v2 = vld [vmem:[#allocation3 + $0x70] sm:$0xff]  ;;  %vm170_vm0 = vcmask 130048   ;;  %vm213_vm4 = vcmask 7168  }
   0x9   :  { %v77_v3 = vld [vmem:[#allocation3 + $0xf8] sm:$0xff]  ;;  %82 = vmatpush.msra.mxu0 %v61_v1  ;;  %v76_v4 = vld [vmem:[#allocation3 + $0xf0] sm:$0xff]  ;;  %v59_v5 = vld [vmem:[#allocation3 + $0x68] sm:$0xff] }
   0xa   :  { %102 = vmatpush.msra.mxu1 %v77_v3  ;;  %v75_v6 = vld [vmem:[#allocation3 + $0xe8] sm:$0xff]  ;;  %v58_v7 = vld [vmem:[#allocation3 + $0x60] sm:$0xff]  ;;  %v57_v9 = vld [vmem:[#allocation3 + $0x58] sm:$0xff] }
   0xb   :  { %83 = vmatpush.msra.mxu0 %v60_v2  ;;  %v74_v8 = vld [vmem:[#allocation3 + $0xe0] sm:$0xff]  ;;  %v73_v10 = vld [vmem:[#allocation3 + $0xd8] sm:$0xff]  ;;  %v56_v11 = vld [vmem:[#allocation3 + $0x50] sm:$0xff] }
   0xc   :  { %103 = vmatpush.msra.mxu1 %v76_v4  ;;  %v72_v12 = vld [vmem:[#allocation3 + $0xd0] sm:$0xff]  ;;  %v55_v13 = vld [vmem:[#allocation3 + $0x48] sm:$0xff]  ;;  %v54_v17 = vld [vmem:[#allocation3 + $0x40] sm:$0xff] }
   0xd   :  { %84 = vmatpush.msra.mxu0 %v59_v5  ;;  %v71_v14 = vld [vmem:[#allocation3 + $0xc8] sm:$0xff]  ;;  %v138_v15 = vld [vmem:[%s379_s3 + $0x78] sm:$0xff]  ;;  %v70_v18 = vld [vmem:[#allocation3 + $0xc0] sm:$0xff] }
   0xe   :  { %104 = vmatpush.msra.mxu1 %v75_v6  ;;  %v137_v16 = vld [vmem:[%s379_s3 + $0x70] sm:$0xff]  ;;  %143 = vmatpush.msra.mxu2 %v138_v15  ;;  %v136_v19 = vld [vmem:[%s379_s3 + $0x68] sm:$0xff]  ;;  %v53_v20 = vld [vmem:[#allocation3 + $0x38] sm:$0xff] }
   0xf   :  { %85 = vmatpush.msra.mxu0 %v58_v7  ;;  %v69_v21 = vld [vmem:[#allocation3 + $0xb8] sm:$0xff]  ;;  %v52_v22 = vld [vmem:[#allocation3 + $0x30] sm:$0xff]  ;;  %v51_v26 = vld [vmem:[#allocation3 + $0x28] sm:$0xff] }
  0x10   :  { %105 = vmatpush.msra.mxu1 %v74_v8  ;;  %144 = vmatpush.msra.mxu2 %v137_v16  ;;  %v135_v23 = vld [vmem:[%s379_s3 + $0x60] sm:$0xff]  ;;  %v68_v24 = vld [vmem:[#allocation3 + $0xb0] sm:$0xff]  ;;  %v67_v27 = vld [vmem:[#allocation3 + $0xa8] sm:$0xff] }
  0x11   :  { %86 = vmatpush.msra.mxu0 %v57_v9  ;;  %v134_v25 = vld [vmem:[%s379_s3 + $0x58] sm:$0xff]  ;;  %v133_v28 = vld [vmem:[%s379_s3 + $0x50] sm:$0xff]  ;;  %v50_v29 = vld [vmem:[#allocation3 + $0x20] sm:$0xff] }
  0x12   :  { %106 = vmatpush.msra.mxu1 %v73_v10  ;;  %145 = vmatpush.msra.mxu2 %v136_v19  ;;  %v66_v30 = vld [vmem:[#allocation3 + $0xa0] sm:$0xff]  ;;  %v49_v32 = vld [vmem:[#allocation3 + $0x18] sm:$0xff]  ;;  %v48_v35 = vld [vmem:[#allocation3 + $0x10] sm:$0xff] }
  0x13   :  { %87 = vmatpush.msra.mxu0 %v56_v11  ;;  %v132_v31 = vld [vmem:[%s379_s3 + $0x48] sm:$0xff]  ;;  %v65_v33 = vld [vmem:[#allocation3 + $0x98] sm:$0xff]  ;;  %v64_v36 = vld [vmem:[#allocation3 + $0x90] sm:$0xff] }
  0x14   :  { %107 = vmatpush.msra.mxu1 %v72_v12  ;;  %146 = vmatpush.msra.mxu2 %v135_v23  ;;  %v131_v34 = vld [vmem:[%s379_s3 + $0x40] sm:$0xff]  ;;  %v130_v37 = vld [vmem:[%s379_s3 + $0x38] sm:$0xff]  ;;  %v47_v38 = vld [vmem:[#allocation3 + $0x8] sm:$0xff] }
  0x15   :  { %88 = vmatpush.msra.mxu0 %v55_v13  ;;  %v63_v39 = vld [vmem:[#allocation3 + $0x88] sm:$0xff]  ;;  %v46_v41 = vld [vmem:[#allocation3] sm:$0xff]  ;;  %v126_v47 = vld [vmem:[%s379_s3 + $0x18] sm:$0xff] }
  0x16   :  { %108 = vmatpush.msra.mxu1 %v71_v14  ;;  %147 = vmatpush.msra.mxu2 %v134_v25  ;;  %v129_v40 = vld [vmem:[%s379_s3 + $0x30] sm:$0xff]  ;;  %v62_v42 = vld [vmem:[#allocation3 + $0x80] sm:$0xff]  ;;  %v225_v51 = vld [vmem:[%s378_s2] ss:$0 sm:$0xff] }
  0x17   :  { %89 = vmatpush.msra.mxu0 %v54_v17  ;;  %v44_v43 = vld [vmem:[%s376_s0] sm:$0xff]  ;;  %v45_v44 = vld [vmem:[%s376_s0 + $0x8] sm:$0xff]  ;;  %v125_v48 = vld [vmem:[%s379_s3 + $0x10] sm:$0xff] }
  0x18   :  { %109 = vmatpush.msra.mxu1 %v70_v18  ;;  %148 = vmatpush.msra.mxu2 %v133_v28  ;;  %v128_v45 = vld [vmem:[%s379_s3 + $0x28] sm:$0xff]  ;;  %v127_v46 = vld [vmem:[%s379_s3 + $0x20] sm:$0xff] }
  0x19   :  { %90 = vmatpush.msra.mxu0 %v53_v20  ;;  %v124_v49 = vld [vmem:[%s379_s3 + $0x8] sm:$0xff]  ;;  %v123_v50 = vld [vmem:[%s379_s3] sm:$0xff] }
  0x1a   :  { %110 = vmatpush.msra.mxu1 %v69_v21  ;;  %149 = vmatpush.msra.mxu2 %v132_v31  ;;  %v165_v57 = vld [vmem:[%s381_s5 + $0x8] sm:$0xff]  ;;  %v164_v58 = vld [vmem:[%s381_s5] sm:$0xff] }
  0x1b   :  { %91 = vmatpush.msra.mxu0 %v52_v22  ;;  %188 = vmatpush.msra.mxu3 %v165_v57  ;;  %v226_v59 = vld [vmem:[%s380_s4] ss:$0 sm:$0xff] }
  0x1c   :  { %111 = vmatpush.msra.mxu1 %v68_v24  ;;  %150 = vmatpush.msra.mxu2 %v131_v34  ;;  %v227_v63 = vld [vmem:[#allocation2] ss:$0 sm:$0xff] }
  0x1d   :  { %92 = vmatpush.msra.mxu0 %v51_v26  ;;  %189 = vmatpush.msra.mxu3 %v164_v58 }
  0x1e   :  { %112 = vmatpush.msra.mxu1 %v67_v27  ;;  %151 = vmatpush.msra.mxu2 %v130_v37 }
  0x1f   :  { %93 = vmatpush.msra.mxu0 %v50_v29 }
  0x20   :  { %113 = vmatpush.msra.mxu1 %v66_v30  ;;  %152 = vmatpush.msra.mxu2 %v129_v40 }
  0x21   :  { %94 = vmatpush.msra.mxu0 %v49_v32 }
  0x22   :  { %114 = vmatpush.msra.mxu1 %v65_v33  ;;  %153 = vmatpush.msra.mxu2 %v128_v45 }
  0x23   :  { %95 = vmatpush.msra.mxu0 %v48_v35 }
  0x24   :  { %115 = vmatpush.msra.mxu1 %v64_v36  ;;  %154 = vmatpush.msra.mxu2 %v127_v46 }
  0x25   :  { %96 = vmatpush.msra.mxu0 %v47_v38 }
  0x26   :  { %116 = vmatpush.msra.mxu1 %v63_v39  ;;  %155 = vmatpush.msra.mxu2 %v126_v47 }
  0x27   :  { %97 = vmatpush.msra.mxu0 %v46_v41 }
  0x28   :  { %117 = vmatpush.msra.mxu1 %v62_v42  ;;  %98 = vmatmul.f32.vlgmr.msra.gmra.mxu0 %v44_v43 }
  0x29   :  { %118 = vmatmul.f32.vlgmr.msra.gmra.mxu1 %v45_v44  ;;  %156 = vmatpush.msra.mxu2 %v125_v48 }
  0x2b   :  { %157 = vmatpush.msra.mxu2 %v124_v49 }
  0x2d   :  { %158 = vmatpush.msra.mxu2 %v123_v50 }
  0xa5   :  { %v99_v52 = vpop.f32.mrf.mxu0 }
  0xa6   :  { %v119_v53 = vpop.f32.mrf.mxu1  ;;  %v100_v54 = vadd.f32 %v225_v51, %v99_v52 }
  0xa8   :  { %v120_v55 = vadd.f32 %v119_v53, %v100_v54 }
  0xaa   :  { %v122_v56 = vmax.f32 %v120_v55, 0.0 }
  0xac   :  { %159 = vmatmul.f32.vlgmr.msra.gmra.mxu2 %v122_v56 }
 0x12f   :  { %v160_v60 = vpop.f32.mrf.mxu2 }
 0x130   :  { %v161_v61 = vadd.f32 %v226_v59, %v160_v60 }
 0x132   :  { %v163_v62 = vmax.f32 %v161_v61, 0.0 }
 0x134   :  { %220 = vmatmul.msk.f32.vlgmr.msra.gmra.mxu3 %vm170_vm0, %v163_v62 }
 0x1b7   :  { %v191_v0 = vpop.f32.mrf.mxu3 }
 0x1b8   :  { %v192_v1 = vadd.f32 %v227_v63, %v191_v0 }
 0x1ba   :  { %v221_v2 = vmul.f32 -1.442695, %v192_v1 }
 0x1bc   :  { %228 = vpow2.f32 %v221_v2 }
 0x1c2   :  { %v229_v3 = vpop.eup %228 }
 0x1c3   :  { %v197_v4 = vadd.f32 1.0, %v229_v3 }
 0x1c5   :  { %230 = vrcp.f32 %v197_v4  ;;  %v209_v8 = vand.u32 2147483648, %v197_v4  ;;  %v207_v10 = vand.u32 2147483647, %v197_v4  ;;  %vm203_vm2 = vweird.f32 %v197_v4 }
 0x1c7   :  { %v210_v12 = vor.u32 1.1754944e-38, %v209_v8  ;;  %vm208_vm5 = vcmp.eq.f32.partialorder %v207_v10, 8.507059e+37 }
 0x1cb   :  { %v231_v5 = vpop.eup %230 }
 0x1cc   :  { %v199_v6 = vmul.f32 %v231_v5, %v197_v4  ;;  %vm204_vm1 = vweird.f32 %v231_v5 }
 0x1cd   :  { %vm205_vm3 = vmor %vm203_vm2, %vm204_vm1 }
 0x1ce   :  { %v200_v7 = vsub.f32 1.0, %v199_v6 }
 0x1d0   :  { %v201_v9 = vmul.f32 %v231_v5, %v200_v7 }
 0x1d2   :  { %v202_v11 = vadd.f32 %v231_v5, %v201_v9 }
 0x1d4   :  { %v206_v13 = vsel %vm205_vm3, %v231_v5, %v202_v11 }
 0x1d5   :  { %v211_v14 = vsel %vm208_vm5, %v210_v12, %v206_v13 }
 0x1d6   :  { %214 = vst.msk [vmem:[%s383_s7] sm:$0xff] %vm213_vm4, %v211_v14 }
 0x1d7   :  { %219 = vsyncpa [#allocation4], 1 }

</bundles_post_ra>
